<compile_context>
chip_gen: v6e
topology: v6e:2x2x1
jax: 0.10.0
libtpu: 0.0.40
codegen_flags: <defaults>
</compile_context>

<pallas_src>
import functools

import jax
import jax.numpy as jnp
from jax import lax
from jax.experimental import pallas as pl
from jax.experimental.pallas import tpu as pltpu


def _round_up(x, m):
    return ((x + m - 1) // m) * m


def _sublane_multiple(dtype):
    # 8 rows per vreg for 32-bit, 16 for 16-bit, 32 for 8-bit.
    itemsize = jnp.dtype(dtype).itemsize
    return 8 * max(1, 4 // itemsize)


def _feature_extractor_kernel(scale_ref, x_ref, w_ref, b_ref, o_ref, *, eps):
    # scale_ref: (1, 1) f32 in SMEM
    # x_ref: (TN, C) activations (native dtype)
    # w_ref: (C, E)  pre-transposed weight (native / bf16 dtype)
    # b_ref: (1, E)  f32 bias
    # o_ref: (TN, E)
    xv = x_ref[...]
    wv = w_ref[...]
    if xv.dtype != wv.dtype:
        # Explicit cast so jnp.dot does not silently promote both to f32 and
        # defeat the native-rate MXU path (e.g. f32 activations, bf16 weights).
        xv = xv.astype(wv.dtype)
    # TODO(synk): for very small C (< ~32) a VPU outer-product path could beat
    # the mostly-empty systolic array; the op is HBM-bound here so MXU is kept.
    emb = jnp.dot(xv, wv, preferred_element_type=jnp.float32)
    emb = emb + b_ref[...]

    # F.normalize(emb, p=2, dim=1, eps): emb / max(||emb||, eps)
    sq = jnp.sum(emb * emb, axis=-1, keepdims=True)
    # 1 / max(sqrt(sq), eps) == rsqrt(max(sq, eps^2))  -> EUP, no VALU divide.
    inv = lax.rsqrt(jnp.maximum(sq, eps * eps))
    scale = scale_ref[0, 0]
    o_ref[...] = (emb * (scale * inv)).astype(o_ref.dtype)


def prepare_params(weight, bias, param_dtype=None):
    """One-time parameter prep (off the per-call hot path).

    Args:
      weight: (E, C) linear weight (PyTorch convention).
      bias:   (E,) linear bias.
      param_dtype: optional storage dtype for the weight (e.g. jnp.bfloat16 to
        halve weight DMA/VMEM and run the MXU at full bf16 rate).
    Returns:
      (w_t, b2d): weight pre-transposed to (C, E) and bias as (1, E) f32.
    """
    E, C = weight.shape
    if param_dtype is None:
        param_dtype = weight.dtype
    w_t = jnp.asarray(weight.T, dtype=param_dtype)          # (C, E)
    b2d = jnp.asarray(bias, dtype=jnp.float32).reshape(1, E)
    return w_t, b2d


def feature_extractor(x, w_t, b2d, emb_scale, block_rows=1024):
    """Forward pass: Linear -> L2 normalize (dim=1) -> * emb_scale.

    Args:
      x: (N, C) or (N, C, 1, 1) array.
      w_t: (C, E) pre-transposed weight from prepare_params.
      b2d: (1, E) f32 bias from prepare_params.
      emb_scale: scalar (Python number or 0-d array) — passed via SMEM.
      block_rows: max row tile (auto-shrunk to fit the VMEM budget).
    Returns:
      (N, E) scaled, L2-normalized embeddings in x's dtype.
    """
    if x.ndim == 4:
        assert x.shape[2] == 1 and x.shape[3] == 1, "spatial dims must be [1, 1]"
    x2d = x.reshape(x.shape[0], -1)               # flatten(start_dim=1)
    N, C = x2d.shape
    Cw, E = w_t.shape
    assert Cw == C, f"weight expects C={Cw}, got C={C}"

    in_item = x2d.dtype.itemsize
    out_item = in_item
    sub = _sublane_multiple(x2d.dtype)

    # --- Generation-aware VMEM budget (v7x: 64 MiB/TC, v5e/v6e: 128 MiB). ---
    try:
        vmem_cap = int(pltpu.get_tpu_info().vmem_capacity_bytes)
    except Exception:
        vmem_cap = 64 << 20                       # conservative (v7x per-TC)
    budget = (vmem_cap * 3) // 4                  # ~48 MiB v7x, ~96 MiB v5e/v6e

    w_bytes = C * E * w_t.dtype.itemsize + E * 4  # resident weight + f32 bias

    def tile_bytes(tn, w_buffers):
        io = 2 * tn * C * in_item + 2 * tn * E * out_item   # dbl-buffered x/out tiles
        inter = 2 * tn * E * 4                              # f32 emb + emb*emb
        return io + inter + w_buffers * w_bytes

    # TODO(synk): if the resident weight alone exceeds the budget (huge C*E on
    # 64 MiB v7x), tile C on a second "arbitrary" grid axis with an f32 VMEM
    # accumulator + pl.when init/finalize instead of failing here.
    assert w_bytes <= budget, (
        "resident weight does not fit VMEM budget; K-tiling not implemented")

    # --- Row tile: dtype-native sublane multiple, >=2 grid steps when possible
    # (v7x 2-TC split), 128-aligned when large (MXU M dim), VMEM-shrunk. ---
    TN = min(block_rows, _round_up(pl.cdiv(N, 2), sub))
    TN = max(_round_up(TN, sub), sub)
    if TN >= 256:
        TN = (TN // 128) * 128
    while TN > sub and tile_bytes(TN, 1) > budget:
        TN = max(_round_up(TN // 2, sub), sub)

    grid = (pl.cdiv(N, TN),)   # ragged last block: masked edge DMA, no pad/slice

    scale = jnp.asarray(emb_scale, dtype=jnp.float32).reshape(1, 1)
    kernel = functools.partial(_feature_extractor_kernel, eps=1e-12)

    def build(single_buffer_weights):
        w_buf = 1 if single_buffer_weights else 2
        vmem_limit = int(min(tile_bytes(TN, w_buf) + (8 << 20),
                             vmem_cap - (8 << 20)))
        resident_kwargs = (
            dict(pipeline_mode=pl.Buffered(1)) if single_buffer_weights else {})
        return pl.pallas_call(
            kernel,
            out_shape=jax.ShapeDtypeStruct((N, E), x2d.dtype),
            grid=grid,
            in_specs=[
                pl.BlockSpec(memory_space=pltpu.MemorySpace.SMEM),   # emb_scale
                pl.BlockSpec((TN, C), lambda i: (i, 0)),             # x rows
                pl.BlockSpec((C, E), lambda i: (0, 0), **resident_kwargs),  # W
                pl.BlockSpec((1, E), lambda i: (0, 0), **resident_kwargs),  # b
            ],
            out_specs=pl.BlockSpec((TN, E), lambda i: (i, 0)),
            compiler_params=pltpu.CompilerParams(
                dimension_semantics=("parallel",),   # v7x: row tiles over 2 TCs
                vmem_limit_bytes=vmem_limit,
            ),
        )

    try:
        # Resident weight/bias single-buffered (index_map is constant).
        out = build(True)(scale, x2d, w_t, b2d)
    except Exception:
        # Fallback: default double-buffering if Buffered(1) is rejected.
        out = build(False)(scale, x2d, w_t, b2d)
    return out


def _reference(x, weight, bias, emb_scale):
    """Pure-JAX reference mirroring the PyTorch forward (f32)."""
    x2d = x.reshape(x.shape[0], -1).astype(jnp.float32)
    emb = x2d @ weight.T.astype(jnp.float32) + bias.astype(jnp.float32)
    norm = jnp.sqrt(jnp.sum(emb * emb, axis=1, keepdims=True))
    emb = emb / jnp.maximum(norm, 1e-12)
    return emb_scale * emb


if __name__ == "__main__":
    key = jax.random.PRNGKey(0)
    emb_scale = 10.0

    # --- Test 1: module-style input (N, C, 1, 1), f32, exact tile fit. ---
    N, C, E = 8, 4, 32
    k_x, k_w, k_b, key = (*jax.random.split(key, 3), jax.random.split(key)[0])
    x = jax.random.normal(k_x, (N, C, 1, 1), dtype=jnp.float32)
    bound = 1.0 / (C ** 0.5)
    weight = jax.random.uniform(k_w, (E, C), minval=-bound, maxval=bound,
                                dtype=jnp.float32)
    bias = jax.random.uniform(k_b, (E,), minval=-bound, maxval=bound,
                              dtype=jnp.float32)
    w_t, b2d = prepare_params(weight, bias)
    out = jax.block_until_ready(feature_extractor(x, w_t, b2d, emb_scale))
    ref = _reference(x, weight, bias, emb_scale)
    assert out.shape == (N, E)
    assert jnp.allclose(out, ref, atol=1e-4, rtol=1e-4), "test1 mismatch"

    # --- Test 2: ragged row count (N % TN != 0), no padding / slicing. ---
    N2 = 37
    k_x2, key = jax.random.split(key)
    x2 = jax.random.normal(k_x2, (N2, C), dtype=jnp.float32)
    out2 = jax.block_until_ready(feature_extractor(x2, w_t, b2d, emb_scale))
    ref2 = _reference(x2, weight, bias, emb_scale)
    assert out2.shape == (N2, E)
    assert jnp.allclose(out2, ref2, atol=1e-4, rtol=1e-4), "test2 mismatch"

    # --- Test 3: bf16 weights (native MXU rate), lane-dense E=256, ragged N. ---
    N3, C3, E3 = 19, 16, 256
    k_x3, k_w3, k_b3 = jax.random.split(key, 3)
    x3 = jax.random.normal(k_x3, (N3, C3), dtype=jnp.float32)
    bound3 = 1.0 / (C3 ** 0.5)
    w3 = jax.random.uniform(k_w3, (E3, C3), minval=-bound3, maxval=bound3,
                            dtype=jnp.float32)
    b3 = jax.random.uniform(k_b3, (E3,), minval=-bound3, maxval=bound3,
                            dtype=jnp.float32)
    w_t3, b2d3 = prepare_params(w3, b3, param_dtype=jnp.bfloat16)
    out3 = jax.block_until_ready(feature_extractor(x3, w_t3, b2d3, emb_scale))
    ref3 = _reference(x3.astype(jnp.bfloat16).astype(jnp.float32),
                      w3.astype(jnp.bfloat16).astype(jnp.float32), b3, emb_scale)
    assert out3.shape == (N3, E3)
    assert jnp.allclose(out3.astype(jnp.float32), ref3, atol=2e-2, rtol=2e-2), \
        "test3 mismatch"

    print("KERNEL_OK")
</pallas_src>

<mosaic_0001>
module attributes {stable_mosaic.version = 11 : i64} {
  func.func @_feature_extractor_kernel(%arg0: i32, %arg1: memref<1x1xf32, #tpu.memory_space<smem>>, %arg2: memref<8x4xf32, #tpu.memory_space<vmem>>, %arg3: memref<4x32xf32, #tpu.memory_space<vmem>>, %arg4: memref<1x32xf32, #tpu.memory_space<vmem>>, %arg5: memref<8x32xf32, #tpu.memory_space<vmem>>) attributes {dimension_semantics = [#tpu.dimension_semantics<parallel>], iteration_bounds = array<i64: 1>, scalar_prefetch = 0 : i64, scratch_operands = 0 : i64, tpu.core_type = #tpu.core_type<tc>, window_params = [{transform_indices = @transform_0, window_bounds = array<i64: 1, 1>}, {transform_indices = @transform_1, window_bounds = array<i64: 8, 4>}, {pipeline_mode = #tpu.pipeline_mode<synchronous>, transform_indices = @transform_2, window_bounds = array<i64: 4, 32>}, {pipeline_mode = #tpu.pipeline_mode<synchronous>, transform_indices = @transform_3, window_bounds = array<i64: 1, 32>}, {transform_indices = @transform_4, window_bounds = array<i64: 8, 32>}]} {
    %c0 = arith.constant 0 : index
    %c0_0 = arith.constant 0 : index
    %0 = vector.load %arg2[%c0, %c0_0] : memref<8x4xf32, #tpu.memory_space<vmem>>, vector<8x4xf32>
    %c0_1 = arith.constant 0 : index
    %c0_2 = arith.constant 0 : index
    %1 = vector.load %arg3[%c0_1, %c0_2] : memref<4x32xf32, #tpu.memory_space<vmem>>, vector<4x32xf32>
    %cst = arith.constant dense<0.000000e+00> : vector<8x32xf32>
    %2 = tpu.matmul %0, %1, %cst {dimension_numbers = #tpu.dot_dimension_numbers<[1], [0], [0], [1], [0, 0, 1, 1], [], []>} : vector<8x4xf32>, vector<4x32xf32>, vector<8x32xf32> -> vector<8x32xf32>
    %c0_3 = arith.constant 0 : index
    %c0_4 = arith.constant 0 : index
    %3 = vector.load %arg4[%c0_3, %c0_4] : memref<1x32xf32, #tpu.memory_space<vmem>>, vector<1x32xf32>
    %4 = vector.broadcast %3 : vector<1x32xf32> to vector<8x32xf32>
    %5 = arith.addf %2, %4 : vector<8x32xf32>
    %6 = arith.mulf %5, %5 : vector<8x32xf32>
    %cst_5 = arith.constant dense<0.000000e+00> : vector<8xf32>
    %7 = vector.multi_reduction <add>, %6, %cst_5 [1] : vector<8x32xf32> to vector<8xf32>
    %8 = vector.shape_cast %7 : vector<8xf32> to vector<8x1xf32>
    %cst_6 = arith.constant 1.000000e-24 : f32
    %9 = vector.broadcast %cst_6 : f32 to vector<8x1xf32>
    %10 = arith.maximumf %8, %9 : vector<8x1xf32>
    %11 = math.rsqrt %10 : vector<8x1xf32>
    %c0_7 = arith.constant 0 : index
    %c0_8 = arith.constant 0 : index
    %12 = memref.load %arg1[%c0_7, %c0_8] : memref<1x1xf32, #tpu.memory_space<smem>>
    %13 = vector.broadcast %12 : f32 to vector<8x1xf32>
    %14 = arith.mulf %13, %11 : vector<8x1xf32>
    %15 = vector.broadcast %14 : vector<8x1xf32> to vector<8x32xf32>
    %16 = arith.mulf %5, %15 : vector<8x32xf32>
    %c0_9 = arith.constant 0 : index
    %c0_10 = arith.constant 0 : index
    %17 = vector.load %arg5[%c0_9, %c0_10] : memref<8x32xf32, #tpu.memory_space<vmem>>, vector<8x32xf32>
    tpu.vector_store %arg5[%c0_9, %c0_10], %16 {strides = array<i32>} : memref<8x32xf32, #tpu.memory_space<vmem>>, vector<8x32xf32>,
    return
  }
  func.func @transform_0(%arg0: i32) -> (i32, i32) {
    %c0_i32 = arith.constant 0 : i32
    %c0_i32_0 = arith.constant 0 : i32
    %c0_i32_1 = arith.constant 0 : i32
    return %c0_i32, %c0_i32_0 : i32, i32
  }
  func.func @transform_1(%arg0: i32) -> (i32, i32) {
    %c0_i32 = arith.constant 0 : i32
    %c0_i32_0 = arith.constant 0 : i32
    return %arg0, %c0_i32 : i32, i32
  }
  func.func @transform_2(%arg0: i32) -> (i32, i32) {
    %c0_i32 = arith.constant 0 : i32
    %c0_i32_0 = arith.constant 0 : i32
    %c0_i32_1 = arith.constant 0 : i32
    return %c0_i32, %c0_i32_0 : i32, i32
  }
  func.func @transform_3(%arg0: i32) -> (i32, i32) {
    %c0_i32 = arith.constant 0 : i32
    %c0_i32_0 = arith.constant 0 : i32
    %c0_i32_1 = arith.constant 0 : i32
    return %c0_i32, %c0_i32_0 : i32, i32
  }
  func.func @transform_4(%arg0: i32) -> (i32, i32) {
    %c0_i32 = arith.constant 0 : i32
    %c0_i32_0 = arith.constant 0 : i32
    return %arg0, %c0_i32 : i32, i32
  }
}

module attributes {stable_mosaic.version = 11 : i64} {
  func.func @_feature_extractor_kernel(%arg0: i32, %arg1: memref<1x1xf32, #tpu.memory_space<smem>>, %arg2: memref<8x4xf32, #tpu.memory_space<vmem>>, %arg3: memref<4x32xf32, #tpu.memory_space<vmem>>, %arg4: memref<1x32xf32, #tpu.memory_space<vmem>>, %arg5: memref<8x32xf32, #tpu.memory_space<vmem>>) attributes {dimension_semantics = [#tpu.dimension_semantics<parallel>], iteration_bounds = array<i64: 1>, scalar_prefetch = 0 : i64, scratch_operands = 0 : i64, tpu.core_type = #tpu.core_type<tc>, window_params = [{transform_indices = @transform_0, window_bounds = array<i64: 1, 1>}, {transform_indices = @transform_1, window_bounds = array<i64: 8, 4>}, {pipeline_mode = #tpu.pipeline_mode<synchronous>, transform_indices = @transform_2, window_bounds = array<i64: 4, 32>}, {pipeline_mode = #tpu.pipeline_mode<synchronous>, transform_indices = @transform_3, window_bounds = array<i64: 1, 32>}, {transform_indices = @transform_4, window_bounds = array<i64: 8, 32>}]} {
    %c0 = arith.constant 0 : index
    %c0_0 = arith.constant 0 : index
    %0 = vector.load %arg2[%c0, %c0_0] : memref<8x4xf32, #tpu.memory_space<vmem>>, vector<8x4xf32>
    %c0_1 = arith.constant 0 : index
    %c0_2 = arith.constant 0 : index
    %1 = vector.load %arg3[%c0_1, %c0_2] : memref<4x32xf32, #tpu.memory_space<vmem>>, vector<4x32xf32>
    %cst = arith.constant dense<0.000000e+00> : vector<8x32xf32>
    %2 = tpu.matmul %0, %1, %cst {dimension_numbers = #tpu.dot_dimension_numbers<[1], [0], [0], [1], [0, 0, 1, 1], [], []>} : vector<8x4xf32>, vector<4x32xf32>, vector<8x32xf32> -> vector<8x32xf32>
    %c0_3 = arith.constant 0 : index
    %c0_4 = arith.constant 0 : index
    %3 = vector.load %arg4[%c0_3, %c0_4] : memref<1x32xf32, #tpu.memory_space<vmem>>, vector<1x32xf32>
    %4 = vector.broadcast %3 : vector<1x32xf32> to vector<8x32xf32>
    %5 = arith.addf %2, %4 : vector<8x32xf32>
    %6 = arith.mulf %5, %5 : vector<8x32xf32>
    %cst_5 = arith.constant dense<0.000000e+00> : vector<8xf32>
    %7 = vector.multi_reduction <add>, %6, %cst_5 [1] : vector<8x32xf32> to vector<8xf32>
    %8 = vector.shape_cast %7 : vector<8xf32> to vector<8x1xf32>
    %cst_6 = arith.constant 1.000000e-24 : f32
    %9 = vector.broadcast %cst_6 : f32 to vector<8x1xf32>
    %10 = arith.maximumf %8, %9 : vector<8x1xf32>
    %11 = math.rsqrt %10 : vector<8x1xf32>
    %c0_7 = arith.constant 0 : index
    %c0_8 = arith.constant 0 : index
    %12 = memref.load %arg1[%c0_7, %c0_8] : memref<1x1xf32, #tpu.memory_space<smem>>
    %13 = vector.broadcast %12 : f32 to vector<8x1xf32>
    %14 = arith.mulf %13, %11 : vector<8x1xf32>
    %15 = vector.broadcast %14 : vector<8x1xf32> to vector<8x32xf32>
    %16 = arith.mulf %5, %15 : vector<8x32xf32>
    %c0_9 = arith.constant 0 : index
    %c0_10 = arith.constant 0 : index
    %17 = vector.load %arg5[%c0_9, %c0_10] : memref<8x32xf32, #tpu.memory_space<vmem>>, vector<8x32xf32>
    tpu.vector_store %arg5[%c0_9, %c0_10], %16 {strides = array<i32>} : memref<8x32xf32, #tpu.memory_space<vmem>>, vector<8x32xf32>,
    return
  }
  func.func @transform_0(%arg0: i32) -> (i32, i32) {
    %c0_i32 = arith.constant 0 : i32
    %c0_i32_0 = arith.constant 0 : i32
    %c0_i32_1 = arith.constant 0 : i32
    return %c0_i32, %c0_i32_0 : i32, i32
  }
  func.func @transform_1(%arg0: i32) -> (i32, i32) {
    %c0_i32 = arith.constant 0 : i32
    %c0_i32_0 = arith.constant 0 : i32
    return %arg0, %c0_i32 : i32, i32
  }
  func.func @transform_2(%arg0: i32) -> (i32, i32) {
    %c0_i32 = arith.constant 0 : i32
    %c0_i32_0 = arith.constant 0 : i32
    %c0_i32_1 = arith.constant 0 : i32
    return %c0_i32, %c0_i32_0 : i32, i32
  }
  func.func @transform_3(%arg0: i32) -> (i32, i32) {
    %c0_i32 = arith.constant 0 : i32
    %c0_i32_0 = arith.constant 0 : i32
    %c0_i32_1 = arith.constant 0 : i32
    return %c0_i32, %c0_i32_0 : i32, i32
  }
  func.func @transform_4(%arg0: i32) -> (i32, i32) {
    %c0_i32 = arith.constant 0 : i32
    %c0_i32_0 = arith.constant 0 : i32
    return %arg0, %c0_i32 : i32, i32
  }
}

</mosaic_0001>

<bundles_post_ra>
// kernel: tpu_custom_call.1
= control target key start
LH: loop header
LB: loop body
LE: loop exit
PB: predicated region body
PF: predicated region fallthrough
CT: control target
= control target key end

     0   :  { %vm32_vm0 = vcmask 1043456   ;;  %v169_v2 = vmov 0.0   ;;  %vm170_vm1 = vmmov 0   ;;  %vm28_vm2 = vcmask 31744   ;;  %s212_s0 = inlined_call_operand.<no memory space> [shape: f32[1,1], index: 0, kind: input, shape index: {}]   ;;  %s213_s1 = inlined_call_operand.vmem [shape: f32[8,4], index: 1, kind: input, shape index: {}]   ;;  %s214_s2 = inlined_call_operand.vmem [shape: f32[4,32], index: 2, kind: input, shape index: {}]   ;;  %s215_s3 = inlined_call_operand.vmem [shape: f32[1,32], index: 3, kind: input, shape index: {}]   ;;  %s216_s4 = inlined_call_operand.hbm [shape: f32[8,32], index: 4, kind: output, shape index: {}]  }
   0x1   :  { %v20_v0 = vld [vmem:[%s214_s2] sm:$0xf]  ;;  %137 = vmatprep.subr.mxu0 %v169_v2  ;;  %139 = vmatprep.mubr.msk.f32.mxu0 %vm170_vm1, %v169_v2 }
   0x2   :  { %v19_v1 = vld [vmem:[%s213_s1] sm:$0xff] }
   0x3   :  { %10 = vsyncpa [#allocation4], 0  ;;  %138 = vmatpush3.msk.msra.mxu0 %vm32_vm0, %v20_v0  ;;  %v132_v3 = vld [vmem:[%s215_s3] ss:$0 sm:$0xff]  ;;  %vm107_vm3 = vcmask 261120   ;;  %v114_v11 = vstv %s212_s0  ;;  %s171_s21 = smov [#allocation3]  }
   0x4   :  { %140 = vmatmul.mubr.msk.f32.vlgmr.msra.gmra.mxu0 %vm28_vm2, %v19_v1  ;;  %s124_s22 = sshll.u32 %s171_s21, 4  ;;  %s125_s22 = int_to_ptr.vmem [resolvable:$true] %s124_s22 }
   0x5   :  { %s147_s3 = scalar_lea.vmem %s125_s22, 128  ;;  %p152_p1 = scmp.lt.s32.totalorder %s125_s22, %s125_s22 }
   0x6   :  { %p148_p0 = scmp.ne.s32.totalorder %s125_s22, %s147_s3  ;;  %p153_p2 = scmp.lt.s32.totalorder %s147_s3, %s147_s3 }
   0x8   :  { %p154_p3 = por %p153_p2, %p152_p1 }
   0xa   :  { %p155_p4 = pnand %p154_p3, %p148_p0 }
  0xc4   :  { %v102_v4 = vpop.f32.mrf.mxu0 }
  0xc5   :  { %v103_v5 = vadd.f32 %v132_v3, %v102_v4 }
  0xc6   :  { %v141_v6 = vpop.f32.mrf.mxu0 }
  0xc7   :  { %v106_v7 = vmul.f32 %v103_v5, %v103_v5 }
  0xc9   :  { %v108_v8 = vsel %vm107_vm3, %v106_v7, 0.0 }
  0xca   :  { %109 = vadd.xlane.f32.xlu0 %v108_v8 }
 0x153   :  { %v110_v9 = vpop.xlane.xlu0 %109 }
 0x154   :  { %v111_v10 = vmax.f32 %v110_v9, 1e-24 }
 0x156   :  { %145 = vrsqrt.f32 %v111_v10 }
 0x163   :  { %v146_v12 = vpop.eup %145 }
 0x164   :  { %v115_v13 = vmul.f32 %v146_v12, %v114_v11 }
 0x166   :  { %v116_v14 = vmul.f32 %v115_v13, %v103_v5 }
 0x168   :  { %117 = vst.msk [vmem:[#allocation3] sm:$0xff] %vm107_vm3, %v116_v14 }
 0x169   :  { %158 = shalt.err (!%p155_p4)
}
 0x16a   :  { %127 = dma.vmem_to_hbm [thread:$0]  %s125_s22, 128, %s216_s4, [#allocation4]  }
 0x16b   :  { %167 = dma.done.wait [#allocation4], 128  }
 0x16c   :  { %168 = vsyncadd [#allocation4], 4294967168 }
 0x16d   :  { %131 = vsyncpa [#allocation4], 1 }

// kernel: tpu_custom_call.1
= control target key start
LH: loop header
LB: loop body
LE: loop exit
PB: predicated region body
PF: predicated region fallthrough
CT: control target
= control target key end

     0   :  { %vm32_vm0 = vcmask 1043456   ;;  %v169_v2 = vmov 0.0   ;;  %vm170_vm1 = vmmov 0   ;;  %vm28_vm2 = vcmask 31744   ;;  %s212_s0 = inlined_call_operand.<no memory space> [shape: f32[1,1], index: 0, kind: input, shape index: {}]   ;;  %s213_s1 = inlined_call_operand.vmem [shape: f32[8,4], index: 1, kind: input, shape index: {}]   ;;  %s214_s2 = inlined_call_operand.vmem [shape: f32[4,32], index: 2, kind: input, shape index: {}]   ;;  %s215_s3 = inlined_call_operand.vmem [shape: f32[1,32], index: 3, kind: input, shape index: {}]   ;;  %s216_s4 = inlined_call_operand.hbm [shape: f32[8,32], index: 4, kind: output, shape index: {}]  }
   0x1   :  { %v20_v0 = vld [vmem:[%s214_s2] sm:$0xf]  ;;  %137 = vmatprep.subr.mxu0 %v169_v2  ;;  %139 = vmatprep.mubr.msk.f32.mxu0 %vm170_vm1, %v169_v2 }
   0x2   :  { %v19_v1 = vld [vmem:[%s213_s1] sm:$0xff] }
   0x3   :  { %10 = vsyncpa [#allocation4], 0  ;;  %138 = vmatpush3.msk.msra.mxu0 %vm32_vm0, %v20_v0  ;;  %v132_v3 = vld [vmem:[%s215_s3] ss:$0 sm:$0xff]  ;;  %vm107_vm3 = vcmask 261120   ;;  %v114_v11 = vstv %s212_s0  ;;  %s171_s21 = smov [#allocation3]  }
   0x4   :  { %140 = vmatmul.mubr.msk.f32.vlgmr.msra.gmra.mxu0 %vm28_vm2, %v19_v1  ;;  %s124_s22 = sshll.u32 %s171_s21, 4  ;;  %s125_s22 = int_to_ptr.vmem [resolvable:$true] %s124_s22 }
   0x5   :  { %s147_s3 = scalar_lea.vmem %s125_s22, 128  ;;  %p152_p1 = scmp.lt.s32.totalorder %s125_s22, %s125_s22 }
   0x6   :  { %p148_p0 = scmp.ne.s32.totalorder %s125_s22, %s147_s3  ;;  %p153_p2 = scmp.lt.s32.totalorder %s147_s3, %s147_s3 }
   0x8   :  { %p154_p3 = por %p153_p2, %p152_p1 }
   0xa   :  { %p155_p4 = pnand %p154_p3, %p148_p0 }
  0xc4   :  { %v102_v4 = vpop.f32.mrf.mxu0 }
  0xc5   :  { %v103_v5 = vadd.f32 %v132_v3, %v102_v4 }
  0xc6   :  { %v141_v6 = vpop.f32.mrf.mxu0 }
  0xc7   :  { %v106_v7 = vmul.f32 %v103_v5, %v103_v5 }
  0xc9   :  { %v108_v8 = vsel %vm107_vm3, %v106_v7, 0.0 }
  0xca   :  { %109 = vadd.xlane.f32.xlu0 %v108_v8 }
 0x153   :  { %v110_v9 = vpop.xlane.xlu0 %109 }
 0x154   :  { %v111_v10 = vmax.f32 %v110_v9, 1e-24 }
 0x156   :  { %145 = vrsqrt.f32 %v111_v10 }
 0x163   :  { %v146_v12 = vpop.eup %145 }
 0x164   :  { %v115_v13 = vmul.f32 %v146_v12, %v114_v11 }
 0x166   :  { %v116_v14 = vmul.f32 %v115_v13, %v103_v5 }
 0x168   :  { %117 = vst.msk [vmem:[#allocation3] sm:$0xff] %vm107_vm3, %v116_v14 }
 0x169   :  { %158 = shalt.err (!%p155_p4)
}
 0x16a   :  { %127 = dma.vmem_to_hbm [thread:$0]  %s125_s22, 128, %s216_s4, [#allocation4]  }
 0x16b   :  { %167 = dma.done.wait [#allocation4], 128  }
 0x16c   :  { %168 = vsyncadd [#allocation4], 4294967168 }
 0x16d   :  { %131 = vsyncpa [#allocation4], 1 }

</bundles_post_ra>
